<compile_context>
chip_gen: v6e
topology: v6e:2x2x1
jax: 0.10.0
libtpu: 0.0.40
codegen_flags: <defaults>
</compile_context>

<pallas_src>
import jax
import jax.numpy as jnp
from jax.experimental import pallas as pl
from jax.experimental.pallas import tpu as pltpu


def _updating_kernel(x_ref, m_ref, o_ref):
    # Elementwise hot path: add + sigmoid.  Compute in f32 (free in the
    # mem-bound regime; avoids awkward bf16 VPU/EUP codegen on v5e), cast back
    # to the output dtype on store.
    s = x_ref[...].astype(jnp.float32) + m_ref[...].astype(jnp.float32)
    o_ref[...] = jax.nn.sigmoid(s).astype(o_ref.dtype)


def _pick_lane_width(total):
    # Widest lane-dense slab whose padding overhead stays negligible.
    for cand in (8192, 4096, 2048, 1024, 512, 256):
        if total >= cand * 8:
            return cand
    return 128


def default_updating_func(x, m, *, target_block_bytes=4 * 1024 * 1024):
    """sigmoid(x + m) for arbitrary (matching) input shapes.

    The contiguous buffers are viewed as a (rows, W) slab with W a multiple of
    128 (lane-dense -> unmasked stores), then tiled along rows with blocks of
    ~target_block_bytes.  2 inputs + 1 output, double-buffered, at 4 MiB/block
    is ~24 MiB of VMEM: fits every generation (v7x 64 MiB physical included).
    """
    assert x.shape == m.shape, "x and m must have the same shape"
    orig_shape = x.shape
    out_dtype = jnp.result_type(x.dtype, m.dtype)
    total = x.size

    # --- lane-dense 2-D view of the contiguous elementwise problem ----------
    lane_w = _pick_lane_width(total)
    pad = (-total) % lane_w
    xf = jnp.ravel(x)
    mf = jnp.ravel(m)
    if pad:
        xf = jnp.pad(xf, (0, pad))
        mf = jnp.pad(mf, (0, pad))
    rows = (total + pad) // lane_w
    x2 = xf.reshape(rows, lane_w)
    m2 = mf.reshape(rows, lane_w)

    # --- row tile sized for VMEM (double-buffered 2 inputs + 1 output) ------
    itemsize = max(jnp.dtype(x.dtype).itemsize, jnp.dtype(out_dtype).itemsize)
    sublane = 16 if itemsize < 4 else 8
    tile_rows = min(rows, max(sublane, target_block_bytes // (lane_w * itemsize)))
    if tile_rows < rows:
        # multiple-of-sublane blocks; the edge block (if partial) is masked by Pallas
        tile_rows = max(sublane, (tile_rows // sublane) * sublane)
    grid = (pl.cdiv(rows, tile_rows),)

    out2 = pl.pallas_call(
        _updating_kernel,
        out_shape=jax.ShapeDtypeStruct((rows, lane_w), out_dtype),
        grid_spec=pltpu.PrefetchScalarGridSpec(
            num_scalar_prefetch=0,
            grid=grid,
            in_specs=[
                pl.BlockSpec((tile_rows, lane_w), lambda i: (i, 0)),
                pl.BlockSpec((tile_rows, lane_w), lambda i: (i, 0)),
            ],
            out_specs=pl.BlockSpec((tile_rows, lane_w), lambda i: (i, 0)),
        ),
        compiler_params=pltpu.CompilerParams(
            # row axis shards across the 2 TensorCores on v7x for large inputs
            dimension_semantics=("parallel",),
            # headroom for the large tiles; still under v7x's 64 MiB physical VMEM
            vmem_limit_bytes=48 * 1024 * 1024,
        ),
    )(x2, m2)

    out_flat = out2.reshape(-1)
    if pad:
        out_flat = out_flat[:total]
    return out_flat.reshape(orig_shape)


if __name__ == "__main__":
    # Module has no parameters (in_features is unused in __init__).
    key = jax.random.PRNGKey(0)
    kx, km, kx2, km2 = jax.random.split(key, 4)

    # Small shapes consistent with the module: [num_nodes, in_features].
    num_nodes, in_features = 16, 32
    x = jax.random.normal(kx, (num_nodes, in_features), dtype=jnp.float32)
    m = jax.random.normal(km, (num_nodes, in_features), dtype=jnp.float32)

    out = default_updating_func(x, m)
    jax.block_until_ready(out)
    ref = jax.nn.sigmoid(x + m)
    assert out.shape == ref.shape and out.dtype == ref.dtype
    assert jnp.allclose(out, ref, atol=2e-6, rtol=2e-6)

    # Second small case exercising the padded / non-lane-aligned path.
    x2 = jax.random.normal(kx2, (10, 33), dtype=jnp.float32)
    m2 = jax.random.normal(km2, (10, 33), dtype=jnp.float32)
    out2 = default_updating_func(x2, m2)
    jax.block_until_ready(out2)
    ref2 = jax.nn.sigmoid(x2 + m2)
    assert out2.shape == ref2.shape and out2.dtype == ref2.dtype
    assert jnp.allclose(out2, ref2, atol=2e-6, rtol=2e-6)

    print("KERNEL_OK")
</pallas_src>

<mosaic_0001>
module attributes {stable_mosaic.version = 11 : i64} {
  func.func @_updating_kernel(%arg0: i32, %arg1: memref<4x128xf32, #tpu.memory_space<vmem>>, %arg2: memref<4x128xf32, #tpu.memory_space<vmem>>, %arg3: memref<4x128xf32, #tpu.memory_space<vmem>>) attributes {dimension_semantics = [#tpu.dimension_semantics<parallel>], iteration_bounds = array<i64: 1>, scalar_prefetch = 0 : i64, scratch_operands = 0 : i64, tpu.core_type = #tpu.core_type<tc>, window_params = [{transform_indices = @transform_0, window_bounds = array<i64: 4, 128>}, {transform_indices = @transform_1, window_bounds = array<i64: 4, 128>}, {transform_indices = @transform_2, window_bounds = array<i64: 4, 128>}]} {
    %c0 = arith.constant 0 : index
    %c0_0 = arith.constant 0 : index
    %0 = vector.load %arg1[%c0, %c0_0] : memref<4x128xf32, #tpu.memory_space<vmem>>, vector<4x128xf32>
    %c0_1 = arith.constant 0 : index
    %c0_2 = arith.constant 0 : index
    %1 = vector.load %arg2[%c0_1, %c0_2] : memref<4x128xf32, #tpu.memory_space<vmem>>, vector<4x128xf32>
    %2 = arith.addf %0, %1 : vector<4x128xf32>
    %3 = arith.negf %2 : vector<4x128xf32>
    %4 = math.exp %3 : vector<4x128xf32>
    %cst = arith.constant 1.000000e+00 : f32
    %5 = vector.broadcast %cst : f32 to vector<4x128xf32>
    %6 = arith.addf %5, %4 : vector<4x128xf32>
    %7 = arith.divf %5, %6 : vector<4x128xf32>
    %c0_3 = arith.constant 0 : index
    %c0_4 = arith.constant 0 : index
    %8 = vector.load %arg3[%c0_3, %c0_4] : memref<4x128xf32, #tpu.memory_space<vmem>>, vector<4x128xf32>
    tpu.vector_store %arg3[%c0_3, %c0_4], %7 {strides = array<i32>} : memref<4x128xf32, #tpu.memory_space<vmem>>, vector<4x128xf32>,
    return
  }
  func.func @transform_0(%arg0: i32) -> (i32, i32) {
    %c0_i32 = arith.constant 0 : i32
    %c0_i32_0 = arith.constant 0 : i32
    return %arg0, %c0_i32 : i32, i32
  }
  func.func @transform_1(%arg0: i32) -> (i32, i32) {
    %c0_i32 = arith.constant 0 : i32
    %c0_i32_0 = arith.constant 0 : i32
    return %arg0, %c0_i32 : i32, i32
  }
  func.func @transform_2(%arg0: i32) -> (i32, i32) {
    %c0_i32 = arith.constant 0 : i32
    %c0_i32_0 = arith.constant 0 : i32
    return %arg0, %c0_i32 : i32, i32
  }
}

</mosaic_0001>

<bundles_post_ra>
// kernel: tpu_custom_call.1
= control target key start
LH: loop header
LB: loop body
LE: loop exit
PB: predicated region body
PF: predicated region fallthrough
CT: control target
= control target key end

     0   :  { %7 = vsyncpa [#allocation3], 0  ;;  %s163_s0 = inlined_call_operand.hbm [shape: f32[4,128], index: 0, kind: input, shape index: {}]   ;;  %s164_s1 = inlined_call_operand.hbm [shape: f32[4,128], index: 1, kind: input, shape index: {}]   ;;  %s165_s2 = inlined_call_operand.hbm [shape: f32[4,128], index: 2, kind: output, shape index: {}]  }
   0x1   :  { %8 = vsyncpa [#allocation6], 0 }
   0x2   :  { %9 = vsyncpa [#allocation4], 0  ;;  %s136_s9 = smov [#allocation2]   ;;  %s137_s11 = smov [#allocation5]  }
   0x3   :  { %s16_s10 = sshll.u32 %s136_s9, 4  ;;  %s26_s12 = sshll.u32 %s137_s11, 4  ;;  %s17_s10 = int_to_ptr.vmem [resolvable:$true] %s16_s10  ;;  %s27_s12 = int_to_ptr.vmem [resolvable:$true] %s26_s12 }
   0x4   :  { %s78_s13 = scalar_lea.vmem %s17_s10, 64  ;;  %p83_p1 = scmp.lt.s32.totalorder %s17_s10, %s17_s10 }
   0x5   :  { %p79_p0 = scmp.ne.s32.totalorder %s17_s10, %s78_s13  ;;  %p84_p2 = scmp.lt.s32.totalorder %s78_s13, %s78_s13 }
   0x7   :  { %p85_p3 = por %p84_p2, %p83_p1 }
   0x9   :  { %p86_p4 = pnand %p85_p3, %p79_p0 }
   0xb   :  { %89 = shalt.err (!%p86_p4)
}
   0xc   :  { %19 = dma.hbm_to_vmem [thread:$0]  %s163_s0, 64, %s17_s10, [#allocation3]  }
   0xd   :  { %s98_s16 = scalar_lea.vmem %s27_s12, 64  ;;  %p103_p6 = scmp.lt.s32.totalorder %s27_s12, %s27_s12 }
   0xe   :  { %p99_p5 = scmp.ne.s32.totalorder %s27_s12, %s98_s16  ;;  %p104_p7 = scmp.lt.s32.totalorder %s98_s16, %s98_s16 }
  0x10   :  { %p105_p8 = por %p104_p7, %p103_p6 }
  0x12   :  { %p106_p9 = pnand %p105_p8, %p99_p5 }
  0x14   :  { %109 = shalt.err (!%p106_p9)
}
  0x15   :  { %29 = dma.hbm_to_vmem [thread:$0]  %s164_s1, 64, %s27_s12, [#allocation6]  }
  0x16   :  { %130 = dma.done.wait [#allocation3], 64  }
  0x17   :  { %131 = vsyncadd [#allocation3], 4294967232 }
  0x18   :  { %132 = dma.done.wait [#allocation6], 64  }
  0x19   :  { %133 = vsyncadd [#allocation6], 4294967232  ;;  %v36_v0 = vld [vmem:[#allocation2] sm:$0xf]  ;;  %v37_v1 = vld [vmem:[#allocation5] sm:$0xf] }
  0x1a   :  { %v38_v2 = vadd.f32 %v37_v1, %v36_v0  ;;  %s138_s0 = smov [#allocation7]  }
  0x1b   :  { %s52_s19 = sshll.u32 %s138_s0, 4  ;;  %s53_s19 = int_to_ptr.vmem [resolvable:$true] %s52_s19 }
  0x1c   :  { %v62_v3 = vmul.f32 -1.442695, %v38_v2  ;;  %s110_s20 = scalar_lea.vmem %s53_s19, 64  ;;  %p115_p11 = scmp.lt.s32.totalorder %s53_s19, %s53_s19 }
  0x1d   :  { %p111_p10 = scmp.ne.s32.totalorder %s53_s19, %s110_s20  ;;  %p116_p12 = scmp.lt.s32.totalorder %s110_s20, %s110_s20 }
  0x1e   :  { %66 = vpow2.f32 %v62_v3 }
  0x1f   :  { %p117_p13 = por %p116_p12, %p115_p11 }
  0x21   :  { %p118_p0 = pnand %p117_p13, %p111_p10 }
  0x2b   :  { %v67_v4 = vpop.eup %66 }
  0x2c   :  { %v42_v5 = vadd.f32 1.0, %v67_v4 }
  0x2e   :  { %68 = vrcp.f32 %v42_v5 }
  0x3b   :  { %v69_v6 = vpop.eup %68 }
  0x3c   :  { %45 = vst [vmem:[#allocation7] sm:$0xf] %v69_v6 }
  0x3d   :  { %121 = shalt.err (!%p118_p0)
}
  0x3e   :  { %55 = dma.vmem_to_hbm [thread:$0]  %s53_s19, 64, %s165_s2, [#allocation4]  }
  0x3f   :  { %134 = dma.done.wait [#allocation4], 64  }
  0x40   :  { %135 = vsyncadd [#allocation4], 4294967232 }
  0x41   :  { %59 = vsyncpa [#allocation3], 1 }
  0x42   :  { %60 = vsyncpa [#allocation6], 1 }
  0x43   :  { %61 = vsyncpa [#allocation4], 1 }

</bundles_post_ra>
